<compile_context>
chip_gen: v5e
topology: v5e:2x2
jax: 0.10.0
libtpu: 0.0.40
codegen_flags: <defaults>
</compile_context>

<pallas_src>
import jax
import jax.numpy as jnp
from jax.experimental import pallas as pl
from jax.experimental.pallas import tpu as pltpu

PRE_OUTPUT = 30      # conv1d in_channels
OUTPUT_NUM = 32      # conv1d out_channels
CHANNEL_SIZE = 7     # conv1d kernel_size
LN_EPS = 1e-5        # torch.nn.LayerNorm default eps

DEFAULT_TILE_B = 4096   # batch-tile rows; 8-aligned, ~8 MiB/step double-buffered


def _round_up(x, m):
    return ((x + m - 1) // m) * m


def _encoder_cnn_kernel(x_ref, w_ref, p_ref, o_ref):
    """Fused conv1d-as-matmul + bias + LayerNorm on one batch tile.

    x_ref: (TILE_B, K)   flattened pre-model output, K = C_in * kernel_size
    w_ref: (K, N)        flattened conv weight, pre-centered over N in the wrapper
    p_ref: (8, N)        row 0: centered conv bias, row 1: LN gamma, row 2: LN beta
    o_ref: (TILE_B, N)
    """
    x = x_ref[...]
    w = w_ref[...]

    # Conv1d with L == kernel_size -> single matmul on the MXU.
    y = jnp.dot(x, w, preferred_element_type=jnp.float32) + p_ref[0:1, :]

    # Weight/bias were pre-centered across the channel axis, so mean_o(y) == 0 and
    # the LayerNorm reduces to a single variance reduction.
    var = jnp.mean(y * y, axis=-1, keepdims=True)
    y_norm = y * jax.lax.rsqrt(var + LN_EPS)

    o_ref[...] = (y_norm * p_ref[1:2, :] + p_ref[2:3, :]).astype(o_ref.dtype)


def encoder_cnn_forward(x_pre, conv_w, conv_b, ln_w, ln_b, *, tile_b=None):
    """x_pre: (B, C_in, L=kernel_size) float32 (output of the pretrained `pre` model).

    Returns (B, C_out, 1) float32, matching the PyTorch module output.
    """
    B, C_in, L = x_pre.shape
    assert C_in == PRE_OUTPUT and L == CHANNEL_SIZE
    C_out = conv_w.shape[0]
    K = C_in * L

    # Glue (plain JAX): flatten conv as matmul operands (same c-major/k-minor order
    # for x and W so the flattened contraction matches Conv1d).
    x_flat = x_pre.reshape(B, K).astype(jnp.float32)           # (B, K)
    w_flat = conv_w.reshape(C_out, K).T.astype(jnp.float32)    # (K, C_out)
    b = conv_b.astype(jnp.float32)

    # Pre-center weight & bias across the output-channel axis: mean_o(y) becomes 0,
    # letting the kernel drop the mean reduction + subtract.
    w_c = w_flat - jnp.mean(w_flat, axis=1, keepdims=True)     # (K, C_out)
    b_c = b - jnp.mean(b)                                      # (C_out,)

    # Stack conv bias / LN gamma / LN beta into one sublane-padded (8, C_out) block.
    params = jnp.zeros((8, C_out), dtype=jnp.float32)
    params = params.at[0].set(b_c)
    params = params.at[1].set(ln_w.reshape(C_out).astype(jnp.float32))
    params = params.at[2].set(ln_b.reshape(C_out).astype(jnp.float32))

    # Batch tiling: 8-aligned tiles, capped so double-buffered tiles fit VMEM on all
    # generations (incl. v7x's 64 MiB). Pad B up to a tile multiple; padded rows are
    # independent under the per-row LayerNorm and sliced off below.
    if tile_b is None:
        tile_b = min(DEFAULT_TILE_B, _round_up(B, 8))
    tile_b = max(8, _round_up(tile_b, 8))
    B_pad = _round_up(B, tile_b)
    if B_pad != B:
        x_flat = jnp.pad(x_flat, ((0, B_pad - B), (0, 0)))

    grid = (pl.cdiv(B_pad, tile_b),)

    out = pl.pallas_call(
        _encoder_cnn_kernel,
        out_shape=jax.ShapeDtypeStruct((B_pad, C_out), jnp.float32),
        grid=grid,
        in_specs=[
            pl.BlockSpec((tile_b, K), lambda i: (i, 0)),     # batch-tiled input
            pl.BlockSpec((K, C_out), lambda i: (0, 0)),      # resident weight
            pl.BlockSpec((8, C_out), lambda i: (0, 0)),      # resident bias/gamma/beta
        ],
        out_specs=pl.BlockSpec((tile_b, C_out), lambda i: (i, 0)),
        compiler_params=pltpu.CompilerParams(
            dimension_semantics=("parallel",)),
    )(x_flat, w_c, params)

    # Drop padded rows; reshape to the PyTorch output layout (B, C_out, 1).
    return out[:B].reshape(B, C_out, 1)


def _reference_forward(x_pre, conv_w, conv_b, ln_w, ln_b):
    """Pure-JAX reference of Conv1d(L==kernel) + LayerNorm([C_out, 1])."""
    y = jnp.einsum("bcl,ocl->bo", x_pre, conv_w) + conv_b        # (B, C_out)
    y = y[:, :, None]                                            # (B, C_out, 1)
    mean = jnp.mean(y, axis=(-2, -1), keepdims=True)
    var = jnp.mean((y - mean) ** 2, axis=(-2, -1), keepdims=True)
    y = (y - mean) / jnp.sqrt(var + LN_EPS)
    return y * ln_w[None] + ln_b[None]


if __name__ == "__main__":
    key = jax.random.PRNGKey(0)
    k_x, k_w, k_b = jax.random.split(key, 3)

    B = 2
    # Input to the kernel = output of the (untranslatable) pretrained `pre` model.
    x_pre = jax.random.normal(k_x, (B, PRE_OUTPUT, CHANNEL_SIZE), dtype=jnp.float32)

    # Deterministic parameter init, mimicking PyTorch Conv1d default init:
    # U(-sqrt(k), sqrt(k)) with k = 1 / (in_channels * kernel_size).
    fan_in = PRE_OUTPUT * CHANNEL_SIZE
    bound = 1.0 / (fan_in ** 0.5)
    conv_w = jax.random.uniform(
        k_w, (OUTPUT_NUM, PRE_OUTPUT, CHANNEL_SIZE),
        minval=-bound, maxval=bound, dtype=jnp.float32)
    conv_b = jax.random.uniform(
        k_b, (OUTPUT_NUM,), minval=-bound, maxval=bound, dtype=jnp.float32)

    # LayerNorm([32, 1]) params: weight=1, bias=0, shape (32, 1).
    ln_w = jnp.ones((OUTPUT_NUM, 1), dtype=jnp.float32)
    ln_b = jnp.zeros((OUTPUT_NUM, 1), dtype=jnp.float32)

    out = encoder_cnn_forward(x_pre, conv_w, conv_b, ln_w, ln_b)
    out = jax.block_until_ready(out)

    ref = _reference_forward(x_pre, conv_w, conv_b, ln_w, ln_b)
    assert out.shape == (B, OUTPUT_NUM, 1), out.shape
    assert jnp.allclose(out, ref, atol=1e-5, rtol=1e-5), \
        float(jnp.max(jnp.abs(out - ref)))

    print("KERNEL_OK")
</pallas_src>

<mosaic_0001>
module attributes {stable_mosaic.version = 11 : i64} {
  func.func @_encoder_cnn_kernel(%arg0: i32, %arg1: memref<8x210xf32, #tpu.memory_space<vmem>>, %arg2: memref<210x32xf32, #tpu.memory_space<vmem>>, %arg3: memref<8x32xf32, #tpu.memory_space<vmem>>, %arg4: memref<8x32xf32, #tpu.memory_space<vmem>>) attributes {dimension_semantics = [#tpu.dimension_semantics<parallel>], iteration_bounds = array<i64: 1>, scalar_prefetch = 0 : i64, scratch_operands = 0 : i64, tpu.core_type = #tpu.core_type<tc>, window_params = [{transform_indices = @transform_0, window_bounds = array<i64: 8, 210>}, {pipeline_mode = #tpu.pipeline_mode<synchronous>, transform_indices = @transform_1, window_bounds = array<i64: 210, 32>}, {pipeline_mode = #tpu.pipeline_mode<synchronous>, transform_indices = @transform_2, window_bounds = array<i64: 8, 32>}, {transform_indices = @transform_3, window_bounds = array<i64: 8, 32>}]} {
    %c0 = arith.constant 0 : index
    %c0_0 = arith.constant 0 : index
    %0 = vector.load %arg1[%c0, %c0_0] : memref<8x210xf32, #tpu.memory_space<vmem>>, vector<8x210xf32>
    %c0_1 = arith.constant 0 : index
    %c0_2 = arith.constant 0 : index
    %1 = vector.load %arg2[%c0_1, %c0_2] : memref<210x32xf32, #tpu.memory_space<vmem>>, vector<210x32xf32>
    %cst = arith.constant dense<0.000000e+00> : vector<8x32xf32>
    %2 = tpu.matmul %0, %1, %cst {dimension_numbers = #tpu.dot_dimension_numbers<[1], [0], [0], [1], [0, 0, 1, 1], [], []>} : vector<8x210xf32>, vector<210x32xf32>, vector<8x32xf32> -> vector<8x32xf32>
    %c0_3 = arith.constant 0 : index
    %c0_4 = arith.constant 0 : index
    %3 = vector.load %arg3[%c0_3, %c0_4] : memref<8x32xf32, #tpu.memory_space<vmem>>, vector<1x32xf32>
    %4 = vector.broadcast %3 : vector<1x32xf32> to vector<8x32xf32>
    %5 = arith.addf %2, %4 : vector<8x32xf32>
    %6 = arith.mulf %5, %5 : vector<8x32xf32>
    %cst_5 = arith.constant dense<0.000000e+00> : vector<8xf32>
    %7 = vector.multi_reduction <add>, %6, %cst_5 [1] : vector<8x32xf32> to vector<8xf32>
    %8 = vector.shape_cast %7 : vector<8xf32> to vector<8x1xf32>
    %cst_6 = arith.constant 3.200000e+01 : f32
    %9 = vector.broadcast %cst_6 : f32 to vector<8x1xf32>
    %10 = arith.divf %8, %9 : vector<8x1xf32>
    %cst_7 = arith.constant 9.99999974E-6 : f32
    %11 = vector.broadcast %cst_7 : f32 to vector<8x1xf32>
    %12 = arith.addf %10, %11 : vector<8x1xf32>
    %13 = math.rsqrt %12 : vector<8x1xf32>
    %14 = vector.broadcast %13 : vector<8x1xf32> to vector<8x32xf32>
    %15 = arith.mulf %5, %14 : vector<8x32xf32>
    %c1 = arith.constant 1 : index
    %c0_8 = arith.constant 0 : index
    %16 = vector.load %arg3[%c1, %c0_8] : memref<8x32xf32, #tpu.memory_space<vmem>>, vector<1x32xf32>
    %17 = vector.broadcast %16 : vector<1x32xf32> to vector<8x32xf32>
    %18 = arith.mulf %15, %17 : vector<8x32xf32>
    %c2 = arith.constant 2 : index
    %c0_9 = arith.constant 0 : index
    %19 = vector.load %arg3[%c2, %c0_9] : memref<8x32xf32, #tpu.memory_space<vmem>>, vector<1x32xf32>
    %20 = vector.broadcast %19 : vector<1x32xf32> to vector<8x32xf32>
    %21 = arith.addf %18, %20 : vector<8x32xf32>
    %c0_10 = arith.constant 0 : index
    %c0_11 = arith.constant 0 : index
    %22 = vector.load %arg4[%c0_10, %c0_11] : memref<8x32xf32, #tpu.memory_space<vmem>>, vector<8x32xf32>
    tpu.vector_store %arg4[%c0_10, %c0_11], %21 {strides = array<i32>} : memref<8x32xf32, #tpu.memory_space<vmem>>, vector<8x32xf32>,
    return
  }
  func.func @transform_0(%arg0: i32) -> (i32, i32) {
    %c0_i32 = arith.constant 0 : i32
    %c0_i32_0 = arith.constant 0 : i32
    return %arg0, %c0_i32 : i32, i32
  }
  func.func @transform_1(%arg0: i32) -> (i32, i32) {
    %c0_i32 = arith.constant 0 : i32
    %c0_i32_0 = arith.constant 0 : i32
    %c0_i32_1 = arith.constant 0 : i32
    return %c0_i32, %c0_i32_0 : i32, i32
  }
  func.func @transform_2(%arg0: i32) -> (i32, i32) {
    %c0_i32 = arith.constant 0 : i32
    %c0_i32_0 = arith.constant 0 : i32
    %c0_i32_1 = arith.constant 0 : i32
    return %c0_i32, %c0_i32_0 : i32, i32
  }
  func.func @transform_3(%arg0: i32) -> (i32, i32) {
    %c0_i32 = arith.constant 0 : i32
    %c0_i32_0 = arith.constant 0 : i32
    return %arg0, %c0_i32 : i32, i32
  }
}

</mosaic_0001>

<bundles_post_ra>
// kernel: tpu_custom_call.1
= control target key start
LH: loop header
LB: loop body
LE: loop exit
PB: predicated region body
PF: predicated region fallthrough
CT: control target
= control target key end

     0   :  { %vm50_vm0 = vcmask 1041408   ;;  %s302_s0 = inlined_call_operand.vmem [shape: f32[8,210], index: 0, kind: input, shape index: {}]   ;;  %s303_s1 = inlined_call_operand.vmem [shape: f32[210,32], index: 1, kind: input, shape index: {}]   ;;  %s304_s2 = inlined_call_operand.vmem [shape: f32[8,32], index: 2, kind: input, shape index: {}]   ;;  %s305_s3 = inlined_call_operand.hbm [shape: f32[8,32], index: 3, kind: output, shape index: {}]  }
   0x1   :  { %v32_v0 = vld [vmem:[%s303_s1 + $0x78] sm:$0xff]  ;;  %v31_v1 = vld [vmem:[%s303_s1 + $0x70] sm:$0xff]  ;;  %v30_v2 = vld [vmem:[%s303_s1 + $0x68] sm:$0xff] }
   0x2   :  { %54 = vmatpush.msra.mxu0 %v32_v0  ;;  %v43_v3 = vld [vmem:[%s303_s1 + $0xd0] sm:$0x3]  ;;  %v42_v4 = vld [vmem:[%s303_s1 + $0xc8] sm:$0xff]  ;;  %v29_v5 = vld [vmem:[%s303_s1 + $0x60] sm:$0xff] }
   0x3   :  { %142 = vmatpush.msk.msra.mxu1 %vm50_vm0, %v43_v3  ;;  %v41_v6 = vld [vmem:[%s303_s1 + $0xc0] sm:$0xff]  ;;  %v28_v7 = vld [vmem:[%s303_s1 + $0x58] sm:$0xff]  ;;  %v27_v9 = vld [vmem:[%s303_s1 + $0x50] sm:$0xff] }
   0x4   :  { %55 = vmatpush.msra.mxu0 %v31_v1  ;;  %v40_v8 = vld [vmem:[%s303_s1 + $0xb8] sm:$0xff]  ;;  %v39_v10 = vld [vmem:[%s303_s1 + $0xb0] sm:$0xff]  ;;  %v26_v11 = vld [vmem:[%s303_s1 + $0x48] sm:$0xff] }
   0x5   :  { %80 = vmatpush.msra.mxu1 %v42_v4  ;;  %v38_v12 = vld [vmem:[%s303_s1 + $0xa8] sm:$0xff] }
   0x6   :  { %56 = vmatpush.msra.mxu0 %v30_v2 }
   0x7   :  { %81 = vmatpush.msra.mxu1 %v41_v6 }
   0x8   :  { %57 = vmatpush.msra.mxu0 %v29_v5 }
   0x9   :  { %82 = vmatpush.msra.mxu1 %v40_v8 }
   0xa   :  { %58 = vmatpush.msra.mxu0 %v28_v7 }
   0xb   :  { %8 = vsyncpa [#allocation3], 0  ;;  %83 = vmatpush.msra.mxu1 %v39_v10  ;;  %v25_v13 = vld [vmem:[%s303_s1 + $0x40] sm:$0xff]  ;;  %v24_v15 = vld [vmem:[%s303_s1 + $0x38] sm:$0xff]  ;;  %vm46_vm1 = vcmask 670720   ;;  %vm95_vm2 = vcmask 261120  }
   0xc   :  { %59 = vmatpush.msra.mxu0 %v27_v9  ;;  %v37_v14 = vld [vmem:[%s303_s1 + $0xa0] sm:$0xff]  ;;  %v36_v16 = vld [vmem:[%s303_s1 + $0x98] sm:$0xff]  ;;  %v23_v17 = vld [vmem:[%s303_s1 + $0x30] sm:$0xff]  ;;  %v179_v36 = vmov 32.0   ;;  %s180_s20 = smov [#allocation2]   ;;  %s133_s24 = sshll.u32 %s305_s3, 4  ;;  %s134_s24 = int_to_ptr.hbm [resolvable:$true] %s133_s24 }
   0xd   :  { %84 = vmatpush.msra.mxu1 %v38_v12  ;;  %v35_v18 = vld [vmem:[%s303_s1 + $0x90] sm:$0xff]  ;;  %v22_v19 = vld [vmem:[%s303_s1 + $0x28] sm:$0xff]  ;;  %v21_v21 = vld [vmem:[%s303_s1 + $0x20] sm:$0xff]  ;;  %149 = vrcp.f32 %v179_v36  ;;  %s131_s21 = sshll.u32 %s180_s20, 4  ;;  %s132_s21 = int_to_ptr.vmem [resolvable:$true] %s131_s21 }
   0xe   :  { %60 = vmatpush.msra.mxu0 %v26_v11  ;;  %v34_v20 = vld [vmem:[%s303_s1 + $0x88] sm:$0xff]  ;;  %v33_v22 = vld [vmem:[%s303_s1 + $0x80] sm:$0xff]  ;;  %v20_v24 = vld [vmem:[%s303_s1 + $0x18] sm:$0xff] }
   0xf   :  { %85 = vmatpush.msra.mxu1 %v37_v14  ;;  %v16_v23 = vld [vmem:[%s302_s0 + $0x8] sm:$0xff]  ;;  %v19_v25 = vld [vmem:[%s303_s1 + $0x10] sm:$0xff]  ;;  %v17_v27 = vld [vmem:[%s303_s1] sm:$0xff] }
  0x10   :  { %61 = vmatpush.msra.mxu0 %v25_v13  ;;  %v18_v26 = vld [vmem:[%s303_s1 + $0x8] sm:$0xff]  ;;  %v15_v28 = vld [vmem:[%s302_s0] sm:$0xff] }
  0x11   :  { %86 = vmatpush.msra.mxu1 %v36_v16  ;;  %v146_v29 = vld [vmem:[%s304_s2] ss:$0 sm:$0xff]  ;;  %v147_v52 = vld [vmem:[%s304_s2 + $0x1] ss:$0 sm:$0xff]  ;;  %v148_v55 = vld [vmem:[%s304_s2 + $0x2] ss:$0 sm:$0xff] }
  0x12   :  { %62 = vmatpush.msra.mxu0 %v24_v15 }
  0x13   :  { %87 = vmatpush.msra.mxu1 %v35_v18  ;;  %v150_v37 = vpop.eup %149 }
  0x14   :  { %63 = vmatpush.msra.mxu0 %v23_v17  ;;  %v100_v38 = vmul.f32 32.0, %v150_v37  ;;  %vm104_vm3 = vweird.f32 %v150_v37 }
  0x15   :  { %88 = vmatpush.msra.mxu1 %v34_v20 }
  0x16   :  { %64 = vmatpush.msra.mxu0 %v22_v19  ;;  %v101_v39 = vsub.f32 1.0, %v100_v38 }
  0x17   :  { %89 = vmatpush.msra.mxu1 %v33_v22 }
  0x18   :  { %65 = vmatpush.msra.mxu0 %v21_v21  ;;  %143 = vmatmul.msk.f32.vlgmr.msra.gmra.mxu1 %vm46_vm1, %v16_v23  ;;  %v102_v40 = vmul.f32 %v150_v37, %v101_v39 }
  0x1a   :  { %66 = vmatpush.msra.mxu0 %v20_v24  ;;  %v103_v41 = vadd.f32 %v150_v37, %v102_v40 }
  0x1c   :  { %67 = vmatpush.msra.mxu0 %v19_v25  ;;  %v105_v42 = vsel %vm104_vm3, %v150_v37, %v103_v41 }
  0x1e   :  { %68 = vmatpush.msra.mxu0 %v18_v26 }
  0x20   :  { %69 = vmatpush.msra.mxu0 %v17_v27 }
  0x21   :  { %70 = vmatmul.f32.vlgmr.msra.gmra.mxu0 %v15_v28 }
  0x95   :  { %v91_v31 = vpop.f32.mrf.mxu1 }
  0x9e   :  { %v71_v30 = vpop.f32.mrf.mxu0 }
  0x9f   :  { %v72_v32 = vadd.f32 %v146_v29, %v71_v30 }
  0xa1   :  { %v92_v33 = vadd.f32 %v91_v31, %v72_v32 }
  0xa3   :  { %v94_v34 = vmul.f32 %v92_v33, %v92_v33 }
  0xa5   :  { %v96_v35 = vsel %vm95_vm2, %v94_v34, 0.0 }
  0xa6   :  { %97 = vadd.xlane.f32.xlu0 %v96_v35 }
 0x119   :  { %v98_v43 = vpop.xlane.xlu0 %97 }
 0x11a   :  { %v106_v44 = vmul.f32 %v105_v42, %v98_v43 }
 0x11c   :  { %v107_v45 = vadd.f32 1e-05, %v106_v44 }
 0x11e   :  { %151 = vrsqrt.f32 %v107_v45  ;;  %vm114_vm5 = vweird.f32 %v107_v45 }
 0x124   :  { %v152_v46 = vpop.eup %151 }
 0x125   :  { %v109_v47 = vmul.f32 %v152_v46, %v107_v45  ;;  %vm115_vm4 = vweird.f32 %v152_v46 }
 0x126   :  { %vm116_vm6 = vmor %vm114_vm5, %vm115_vm4 }
 0x127   :  { %v110_v48 = vmul.f32 %v152_v46, %v109_v47 }
 0x129   :  { %v111_v49 = vmul.f32 0.5, %v110_v48 }
 0x12b   :  { %v112_v50 = vsub.f32 1.5, %v111_v49 }
 0x12d   :  { %v113_v51 = vmul.f32 %v152_v46, %v112_v50 }
 0x12f   :  { %v117_v53 = vsel %vm116_vm6, %v152_v46, %v113_v51 }
 0x130   :  { %v118_v54 = vmul.f32 %v117_v53, %v92_v33 }
 0x132   :  { %v121_v56 = vmul.f32 %v147_v52, %v118_v54 }
 0x134   :  { %v124_v57 = vadd.f32 %v148_v55, %v121_v56 }
 0x136   :  { %125 = vst.msk [vmem:[#allocation2] sm:$0xff] %vm95_vm2, %v124_v57 }
 0x137   :  { %136 = dma.vmem_to_hbm [thread:$0]  %s132_s21, 128, %s134_s24, [#allocation3]  }
 0x138   :  { %177 = dma.done.wait [#allocation3], 128  }
 0x139   :  { %178 = vsyncadd [#allocation3], 4294967168 }
 0x13a   :  { %141 = vsyncpa [#allocation3], 1 }

</bundles_post_ra>
